<compile_context>
chip_gen: v5e
topology: v5e:2x2
jax: 0.10.0
libtpu: 0.0.40
codegen_flags: <defaults>
</compile_context>

<pallas_src>
from functools import partial

import jax
import jax.numpy as jnp
import numpy as np
from jax.experimental import pallas as pl


def _make_stog_kernel(BT, n_caps, routing):
    def kernel(x_ref, w_ref, s_ref, st_ref, e_ref, et_ref, out_ref):
        # x_ref  : (B*T_all, T_all*J)  block-structured activations
        # w_ref  : (T_all*J, n*d_c)    stacked per-t capsule weights (capsule outer)
        # s_ref  : (3*B, B*T_all)      segment-sum-over-t selector (modality, batch)
        # st_ref : (B*T_all, 3*B)      its transpose (broadcast vertex back over t)
        # e_ref  : (n, n*d_c)          capsule -> lane-group expansion indicator
        # et_ref : (n*d_c, n)          its transpose (reduce lane groups -> capsules)
        # out_ref: (3*B, n*d_c)

        # primary capsules: one dense MXU matmul; rows = (b, t_global),
        # lanes = capsule-major (i*d_c + d) -> already the routing layout.
        pri = jnp.dot(x_ref[...], w_ref[...], preferred_element_type=jnp.float32)

        S, St = s_ref[...], st_ref[...]
        E, Et = e_ref[...], et_ref[...]

        b_log = jnp.zeros((BT, n_caps), jnp.float32)
        vertex = None
        for r in range(routing + 1):                       # static unroll
            # softmax over the capsule (lane) axis
            m = jnp.max(b_log, axis=1, keepdims=True)
            exp_b = jnp.exp(b_log - m)
            denom = jnp.sum(exp_b, axis=1, keepdims=True)
            rc = exp_b * pl.reciprocal(denom, approx=True)                # (BT, n)
            # expand rc over each capsule's d_c lanes (indicator matmul)
            rc_exp = jnp.dot(rc, E, preferred_element_type=jnp.float32)   # (BT, n*d_c)
            weighted = pri * rc_exp
            # per-(modality, batch) sum over t -> (3B, n*d_c), then squash
            vertex = jnp.tanh(
                jnp.dot(S, weighted, preferred_element_type=jnp.float32))
            if r < routing:
                # broadcast each vertex back over its t rows, reduce over d_c
                vexp = jnp.dot(St, vertex, preferred_element_type=jnp.float32)
                b_log = b_log + jnp.dot(
                    vexp * pri, Et, preferred_element_type=jnp.float32)   # (BT, n)

        # (the PyTorch final recomputation with the non-detached capsules is
        #  forward-identical to the last iteration's vertex)
        out_ref[...] = vertex                              # one lane-dense store

    return kernel


@partial(jax.jit, static_argnums=(4,))
def capsule_sequence_to_graph(text, audio, video, params, routing):
    W_tpc, W_apc, W_vpc = params
    xs, Ws = (text, audio, video), (W_tpc, W_apc, W_vpc)
    T_list = [int(x.shape[0]) for x in xs]
    T_all = sum(T_list)
    B, J = int(text.shape[1]), int(text.shape[2])
    n, d_c = int(W_tpc.shape[1]), int(W_tpc.shape[3])
    ND = n * d_c

    # ---------------- plain-JAX layout glue (no compute hot path) ----------
    # batch-first activations, concatenated over modalities along t
    x_btj = jnp.concatenate(
        [jnp.transpose(x, (1, 0, 2)).astype(jnp.float32) for x in xs], axis=1)
    # block-structured activations: row (b, t) holds x[b, t, :] in columns
    # [t*J, (t+1)*J) and zeros elsewhere, so ONE dense matmul against the
    # stacked per-t weights computes every per-t primary capsule at once.
    eye_t = jnp.eye(T_all, dtype=jnp.float32)
    x_blk = jnp.einsum("btj,ts->btsj", x_btj, eye_t).reshape(B * T_all, T_all * J)
    # stacked weights: (t, J, n*d_c) with the capsule index as the OUTER factor
    w_stack = jnp.concatenate(
        [jnp.transpose(W, (0, 2, 1, 3)).reshape(int(W.shape[0]), J, ND).astype(jnp.float32)
         for W in Ws], axis=0).reshape(T_all * J, ND)

    # static selector / indicator matrices (numpy -> device constants)
    S_np = np.zeros((3 * B, B * T_all), np.float32)
    off = 0
    for m, Tm in enumerate(T_list):
        for b in range(B):
            S_np[m * B + b, b * T_all + off: b * T_all + off + Tm] = 1.0
        off += Tm
    E_np = np.zeros((n, ND), np.float32)
    for i in range(n):
        E_np[i, i * d_c:(i + 1) * d_c] = 1.0

    kernel = _make_stog_kernel(B * T_all, n, routing)
    out = pl.pallas_call(
        kernel,
        out_shape=jax.ShapeDtypeStruct((3 * B, ND), jnp.float32),
    )(x_blk, w_stack, jnp.asarray(S_np), jnp.asarray(S_np.T),
      jnp.asarray(E_np), jnp.asarray(E_np.T))

    out = out.reshape(3, B, n, d_c)
    return out[0], out[1], out[2]


# --- deterministic parameter init (matches nn.init.xavier_normal_ semantics) ---
def xavier_normal(key, shape):
    rf = 1
    for s in shape[2:]:
        rf *= s
    fan_in = shape[1] * rf
    fan_out = shape[0] * rf
    std = (2.0 / (fan_in + fan_out)) ** 0.5
    return std * jax.random.normal(key, shape, dtype=jnp.float32)


# --- plain-JAX reference (mirrors the PyTorch forward) for a sanity check ---
def reference_modality(x, W, routing):
    pri = jnp.einsum("tbj,tnjd->tbnd", x, W).transpose(1, 0, 2, 3)       # (B, T, n, d)
    B, T, n, d = pri.shape
    b = jnp.zeros((B, T, n), jnp.float32)
    vertex = None
    for r in range(routing + 1):
        rc = jax.nn.softmax(b, axis=2)
        vertex = jnp.tanh(jnp.sum(pri * rc[..., None], axis=1))
        if r < routing:
            b = b + jnp.sum(vertex[:, None, :, :] * pri, axis=3)
    return vertex


if __name__ == "__main__":
    MULT_d, dim_capsule, vertex_num, routing = 16, 8, 4, 3
    T_t, T_a, T_v, batch = 8, 6, 10, 2

    key = jax.random.PRNGKey(0)
    ks = jax.random.split(key, 6)
    W_tpc = xavier_normal(ks[0], (T_t, vertex_num, MULT_d, dim_capsule))
    W_apc = xavier_normal(ks[1], (T_a, vertex_num, MULT_d, dim_capsule))
    W_vpc = xavier_normal(ks[2], (T_v, vertex_num, MULT_d, dim_capsule))

    text = jax.random.normal(ks[3], (T_t, batch, MULT_d), dtype=jnp.float32)
    audio = jax.random.normal(ks[4], (T_a, batch, MULT_d), dtype=jnp.float32)
    video = jax.random.normal(ks[5], (T_v, batch, MULT_d), dtype=jnp.float32)

    tv, av, vv = capsule_sequence_to_graph(
        text, audio, video, (W_tpc, W_apc, W_vpc), routing)
    jax.block_until_ready((tv, av, vv))

    # verify against the pure-JAX reference (tolerance covers the deliberate
    # approximations: EUP approximate reciprocal in the routing softmax and
    # MXU pass rounding in the tiny indicator/segment-sum matmuls).
    for out, x, W in ((tv, text, W_tpc), (av, audio, W_apc), (vv, video, W_vpc)):
        ref = reference_modality(x, W, routing)
        assert out.shape == (batch, vertex_num, dim_capsule)
        assert jnp.allclose(out, ref, atol=5e-3, rtol=5e-3), "mismatch vs reference"

    print("KERNEL_OK")
</pallas_src>

<mosaic_0001>
module attributes {stable_mosaic.version = 11 : i64} {
  func.func @kernel(%arg0: memref<48x384xf32, #tpu.memory_space<vmem>>, %arg1: memref<384x32xf32, #tpu.memory_space<vmem>>, %arg2: memref<6x48xf32, #tpu.memory_space<vmem>>, %arg3: memref<48x6xf32, #tpu.memory_space<vmem>>, %arg4: memref<4x32xf32, #tpu.memory_space<vmem>>, %arg5: memref<32x4xf32, #tpu.memory_space<vmem>>, %arg6: memref<6x32xf32, #tpu.memory_space<vmem>>) attributes {dimension_semantics = [], scalar_prefetch = 0 : i64, scratch_operands = 0 : i64, tpu.core_type = #tpu.core_type<tc>} {
    %c0 = arith.constant 0 : index
    %c0_0 = arith.constant 0 : index
    %0 = vector.load %arg0[%c0, %c0_0] : memref<48x384xf32, #tpu.memory_space<vmem>>, vector<48x384xf32>
    %c0_1 = arith.constant 0 : index
    %c0_2 = arith.constant 0 : index
    %1 = vector.load %arg1[%c0_1, %c0_2] : memref<384x32xf32, #tpu.memory_space<vmem>>, vector<384x32xf32>
    %cst = arith.constant dense<0.000000e+00> : vector<48x32xf32>
    %2 = tpu.matmul %0, %1, %cst {dimension_numbers = #tpu.dot_dimension_numbers<[1], [0], [0], [1], [0, 0, 1, 1], [], []>} : vector<48x384xf32>, vector<384x32xf32>, vector<48x32xf32> -> vector<48x32xf32>
    %c0_3 = arith.constant 0 : index
    %c0_4 = arith.constant 0 : index
    %3 = vector.load %arg2[%c0_3, %c0_4] : memref<6x48xf32, #tpu.memory_space<vmem>>, vector<6x48xf32>
    %c0_5 = arith.constant 0 : index
    %c0_6 = arith.constant 0 : index
    %4 = vector.load %arg3[%c0_5, %c0_6] : memref<48x6xf32, #tpu.memory_space<vmem>>, vector<48x6xf32>
    %c0_7 = arith.constant 0 : index
    %c0_8 = arith.constant 0 : index
    %5 = vector.load %arg4[%c0_7, %c0_8] : memref<4x32xf32, #tpu.memory_space<vmem>>, vector<4x32xf32>
    %c0_9 = arith.constant 0 : index
    %c0_10 = arith.constant 0 : index
    %6 = vector.load %arg5[%c0_9, %c0_10] : memref<32x4xf32, #tpu.memory_space<vmem>>, vector<32x4xf32>
    %cst_11 = arith.constant 0.000000e+00 : f32
    %7 = vector.broadcast %cst_11 : f32 to vector<48x4xf32>
    %cst_12 = arith.constant dense<0xFF800000> : vector<48xf32>
    %8 = vector.multi_reduction <maximumf>, %7, %cst_12 [1] : vector<48x4xf32> to vector<48xf32>
    %9 = vector.shape_cast %8 : vector<48xf32> to vector<48x1xf32>
    %10 = vector.broadcast %9 : vector<48x1xf32> to vector<48x4xf32>
    %11 = arith.subf %7, %10 : vector<48x4xf32>
    %12 = math.exp %11 : vector<48x4xf32>
    %cst_13 = arith.constant dense<0.000000e+00> : vector<48xf32>
    %13 = vector.multi_reduction <add>, %12, %cst_13 [1] : vector<48x4xf32> to vector<48xf32>
    %14 = vector.shape_cast %13 : vector<48xf32> to vector<48x1xf32>
    %15 = tpu.reciprocal %14 {approx = true} : vector<48x1xf32> -> vector<48x1xf32>
    %16 = vector.broadcast %15 : vector<48x1xf32> to vector<48x4xf32>
    %17 = arith.mulf %12, %16 : vector<48x4xf32>
    %cst_14 = arith.constant dense<0.000000e+00> : vector<48x32xf32>
    %18 = tpu.matmul %17, %5, %cst_14 {dimension_numbers = #tpu.dot_dimension_numbers<[1], [0], [0], [1], [0, 0, 1, 1], [], []>} : vector<48x4xf32>, vector<4x32xf32>, vector<48x32xf32> -> vector<48x32xf32>
    %19 = arith.mulf %2, %18 : vector<48x32xf32>
    %cst_15 = arith.constant dense<0.000000e+00> : vector<6x32xf32>
    %20 = tpu.matmul %3, %19, %cst_15 {dimension_numbers = #tpu.dot_dimension_numbers<[1], [0], [0], [1], [0, 0, 1, 1], [], []>} : vector<6x48xf32>, vector<48x32xf32>, vector<6x32xf32> -> vector<6x32xf32>
    %21 = math.tanh %20 : vector<6x32xf32>
    %cst_16 = arith.constant dense<0.000000e+00> : vector<48x32xf32>
    %22 = tpu.matmul %4, %21, %cst_16 {dimension_numbers = #tpu.dot_dimension_numbers<[1], [0], [0], [1], [0, 0, 1, 1], [], []>} : vector<48x6xf32>, vector<6x32xf32>, vector<48x32xf32> -> vector<48x32xf32>
    %23 = arith.mulf %22, %2 : vector<48x32xf32>
    %cst_17 = arith.constant dense<0.000000e+00> : vector<48x4xf32>
    %24 = tpu.matmul %23, %6, %cst_17 {dimension_numbers = #tpu.dot_dimension_numbers<[1], [0], [0], [1], [0, 0, 1, 1], [], []>} : vector<48x32xf32>, vector<32x4xf32>, vector<48x4xf32> -> vector<48x4xf32>
    %25 = arith.addf %7, %24 : vector<48x4xf32>
    %cst_18 = arith.constant dense<0xFF800000> : vector<48xf32>
    %26 = vector.multi_reduction <maximumf>, %25, %cst_18 [1] : vector<48x4xf32> to vector<48xf32>
    %27 = vector.shape_cast %26 : vector<48xf32> to vector<48x1xf32>
    %28 = vector.broadcast %27 : vector<48x1xf32> to vector<48x4xf32>
    %29 = arith.subf %25, %28 : vector<48x4xf32>
    %30 = math.exp %29 : vector<48x4xf32>
    %cst_19 = arith.constant dense<0.000000e+00> : vector<48xf32>
    %31 = vector.multi_reduction <add>, %30, %cst_19 [1] : vector<48x4xf32> to vector<48xf32>
    %32 = vector.shape_cast %31 : vector<48xf32> to vector<48x1xf32>
    %33 = tpu.reciprocal %32 {approx = true} : vector<48x1xf32> -> vector<48x1xf32>
    %34 = vector.broadcast %33 : vector<48x1xf32> to vector<48x4xf32>
    %35 = arith.mulf %30, %34 : vector<48x4xf32>
    %cst_20 = arith.constant dense<0.000000e+00> : vector<48x32xf32>
    %36 = tpu.matmul %35, %5, %cst_20 {dimension_numbers = #tpu.dot_dimension_numbers<[1], [0], [0], [1], [0, 0, 1, 1], [], []>} : vector<48x4xf32>, vector<4x32xf32>, vector<48x32xf32> -> vector<48x32xf32>
    %37 = arith.mulf %2, %36 : vector<48x32xf32>
    %cst_21 = arith.constant dense<0.000000e+00> : vector<6x32xf32>
    %38 = tpu.matmul %3, %37, %cst_21 {dimension_numbers = #tpu.dot_dimension_numbers<[1], [0], [0], [1], [0, 0, 1, 1], [], []>} : vector<6x48xf32>, vector<48x32xf32>, vector<6x32xf32> -> vector<6x32xf32>
    %39 = math.tanh %38 : vector<6x32xf32>
    %cst_22 = arith.constant dense<0.000000e+00> : vector<48x32xf32>
    %40 = tpu.matmul %4, %39, %cst_22 {dimension_numbers = #tpu.dot_dimension_numbers<[1], [0], [0], [1], [0, 0, 1, 1], [], []>} : vector<48x6xf32>, vector<6x32xf32>, vector<48x32xf32> -> vector<48x32xf32>
    %41 = arith.mulf %40, %2 : vector<48x32xf32>
    %cst_23 = arith.constant dense<0.000000e+00> : vector<48x4xf32>
    %42 = tpu.matmul %41, %6, %cst_23 {dimension_numbers = #tpu.dot_dimension_numbers<[1], [0], [0], [1], [0, 0, 1, 1], [], []>} : vector<48x32xf32>, vector<32x4xf32>, vector<48x4xf32> -> vector<48x4xf32>
    %43 = arith.addf %25, %42 : vector<48x4xf32>
    %cst_24 = arith.constant dense<0xFF800000> : vector<48xf32>
    %44 = vector.multi_reduction <maximumf>, %43, %cst_24 [1] : vector<48x4xf32> to vector<48xf32>
    %45 = vector.shape_cast %44 : vector<48xf32> to vector<48x1xf32>
    %46 = vector.broadcast %45 : vector<48x1xf32> to vector<48x4xf32>
    %47 = arith.subf %43, %46 : vector<48x4xf32>
    %48 = math.exp %47 : vector<48x4xf32>
    %cst_25 = arith.constant dense<0.000000e+00> : vector<48xf32>
    %49 = vector.multi_reduction <add>, %48, %cst_25 [1] : vector<48x4xf32> to vector<48xf32>
    %50 = vector.shape_cast %49 : vector<48xf32> to vector<48x1xf32>
    %51 = tpu.reciprocal %50 {approx = true} : vector<48x1xf32> -> vector<48x1xf32>
    %52 = vector.broadcast %51 : vector<48x1xf32> to vector<48x4xf32>
    %53 = arith.mulf %48, %52 : vector<48x4xf32>
    %cst_26 = arith.constant dense<0.000000e+00> : vector<48x32xf32>
    %54 = tpu.matmul %53, %5, %cst_26 {dimension_numbers = #tpu.dot_dimension_numbers<[1], [0], [0], [1], [0, 0, 1, 1], [], []>} : vector<48x4xf32>, vector<4x32xf32>, vector<48x32xf32> -> vector<48x32xf32>
    %55 = arith.mulf %2, %54 : vector<48x32xf32>
    %cst_27 = arith.constant dense<0.000000e+00> : vector<6x32xf32>
    %56 = tpu.matmul %3, %55, %cst_27 {dimension_numbers = #tpu.dot_dimension_numbers<[1], [0], [0], [1], [0, 0, 1, 1], [], []>} : vector<6x48xf32>, vector<48x32xf32>, vector<6x32xf32> -> vector<6x32xf32>
    %57 = math.tanh %56 : vector<6x32xf32>
    %cst_28 = arith.constant dense<0.000000e+00> : vector<48x32xf32>
    %58 = tpu.matmul %4, %57, %cst_28 {dimension_numbers = #tpu.dot_dimension_numbers<[1], [0], [0], [1], [0, 0, 1, 1], [], []>} : vector<48x6xf32>, vector<6x32xf32>, vector<48x32xf32> -> vector<48x32xf32>
    %59 = arith.mulf %58, %2 : vector<48x32xf32>
    %cst_29 = arith.constant dense<0.000000e+00> : vector<48x4xf32>
    %60 = tpu.matmul %59, %6, %cst_29 {dimension_numbers = #tpu.dot_dimension_numbers<[1], [0], [0], [1], [0, 0, 1, 1], [], []>} : vector<48x32xf32>, vector<32x4xf32>, vector<48x4xf32> -> vector<48x4xf32>
    %61 = arith.addf %43, %60 : vector<48x4xf32>
    %cst_30 = arith.constant dense<0xFF800000> : vector<48xf32>
    %62 = vector.multi_reduction <maximumf>, %61, %cst_30 [1] : vector<48x4xf32> to vector<48xf32>
    %63 = vector.shape_cast %62 : vector<48xf32> to vector<48x1xf32>
    %64 = vector.broadcast %63 : vector<48x1xf32> to vector<48x4xf32>
    %65 = arith.subf %61, %64 : vector<48x4xf32>
    %66 = math.exp %65 : vector<48x4xf32>
    %cst_31 = arith.constant dense<0.000000e+00> : vector<48xf32>
    %67 = vector.multi_reduction <add>, %66, %cst_31 [1] : vector<48x4xf32> to vector<48xf32>
    %68 = vector.shape_cast %67 : vector<48xf32> to vector<48x1xf32>
    %69 = tpu.reciprocal %68 {approx = true} : vector<48x1xf32> -> vector<48x1xf32>
    %70 = vector.broadcast %69 : vector<48x1xf32> to vector<48x4xf32>
    %71 = arith.mulf %66, %70 : vector<48x4xf32>
    %cst_32 = arith.constant dense<0.000000e+00> : vector<48x32xf32>
    %72 = tpu.matmul %71, %5, %cst_32 {dimension_numbers = #tpu.dot_dimension_numbers<[1], [0], [0], [1], [0, 0, 1, 1], [], []>} : vector<48x4xf32>, vector<4x32xf32>, vector<48x32xf32> -> vector<48x32xf32>
    %73 = arith.mulf %2, %72 : vector<48x32xf32>
    %cst_33 = arith.constant dense<0.000000e+00> : vector<6x32xf32>
    %74 = tpu.matmul %3, %73, %cst_33 {dimension_numbers = #tpu.dot_dimension_numbers<[1], [0], [0], [1], [0, 0, 1, 1], [], []>} : vector<6x48xf32>, vector<48x32xf32>, vector<6x32xf32> -> vector<6x32xf32>
    %75 = math.tanh %74 : vector<6x32xf32>
    %c0_34 = arith.constant 0 : index
    %c0_35 = arith.constant 0 : index
    %76 = vector.load %arg6[%c0_34, %c0_35] : memref<6x32xf32, #tpu.memory_space<vmem>>, vector<6x32xf32>
    tpu.vector_store %arg6[%c0_34, %c0_35], %75 {strides = array<i32>} : memref<6x32xf32, #tpu.memory_space<vmem>>, vector<6x32xf32>,
    return
  }
}

</mosaic_0001>

<bundles_post_ra>
// kernel: squeeze.3
= control target key start
LH: loop header
LB: loop body
LE: loop exit
PB: predicated region body
PF: predicated region fallthrough
CT: control target
= control target key end

     0   :  { %s102_s0 = inlined_call_operand.vmem [shape: f32[2,32], index: 0, kind: input, shape index: {}]   ;;  %s103_s1 = inlined_call_operand.hbm [shape: f32[2,4,8], index: 1, kind: output, shape index: {}]  }
   0x1   :  { %v5_v0 = vld [vmem:[%s102_s0] sm:$0x3] }
   0x2   :  { %6 = vst [vmem:[#allocation3] sm:$0x3] %v5_v0 }
   0x3   :  { %2 = vsyncpa [#allocation1], 0  ;;  %s82_s0 = smov 120   ;;  %s83_s8 = smov 104   ;;  %vm8_vm0 = vcmask 64512  }
   0x4   :  { %s84_s9 = smov 112   ;;  %s85_s10 = smov [#allocation0]  }
   0x5   :  { %s43_s11 = sshll.u32 %s85_s10, 4  ;;  %s45_s1 = sshll.u32 %s103_s1, 4  ;;  %s44_s11 = int_to_ptr.vmem [resolvable:$true] %s43_s11  ;;  %s46_s1 = int_to_ptr.hbm [resolvable:$true] %s45_s1 }
   0x9   :  { %v10_v1 = vld [vmem:[#allocation3] sm:$0x3]  }
   0xa   :  { %v22_v2 = vld [vmem:[#allocation3] sm:$0x3]   ;;  %11 = vrot.lane.b32.xlu0 %v10_v1, %s82_s0 }
   0xb   :  { %23 = vrot.lane.b32.xlu1 %v22_v2, %s83_s8  ;;  %v16_v3 = vld [vmem:[#allocation3] sm:$0x3]  }
   0xc   :  { %v7_v4 = vld [vmem:[#allocation3] sm:$0x3]  }
   0xd   :  { %9 = vst.msk [vmem:[#allocation2] ss:$8 sm:$0x3] %vm8_vm0, %v7_v4  }
  0x12   :  { %17 = vrot.lane.b32.xlu0 %v16_v3, %s84_s9 }
  0x7c   :  { %v12_v5 = vpop.permute.xlu0 %11  }
  0x7d   :  { %v24_v6 = vpop.permute.xlu1 %23   ;;  %15 = vst.msk [vmem:[#allocation2 + $0x1] ss:$8 sm:$0x3] %vm8_vm0, %v12_v5  }
  0x7e   :  { %27 = vst.msk [vmem:[#allocation2 + $0x3] ss:$8 sm:$0x3] %vm8_vm0, %v24_v6  }
  0x84   :  { %v18_v7 = vpop.permute.xlu0 %17  }
  0x85   :  { %21 = vst.msk [vmem:[#allocation2 + $0x2] ss:$8 sm:$0x3] %vm8_vm0, %v18_v7  }
  0x8c   :  { %v30_v8 = vld [vmem:[#allocation2] sm:$0xf]  ;;  %v35_v9 = vld [vmem:[#allocation2 + $0x8] sm:$0xf] }
  0x8d   :  { %33 = vst [vmem:[#allocation0] sm:$0xf] %v30_v8 }
  0x8e   :  { %39 = vst [vmem:[#allocation0 + $0x4] sm:$0xf] %v35_v9 }
  0x8f   :  { %48 = dma.vmem_to_hbm [thread:$0]  %s44_s11, 128, %s46_s1, [#allocation1]  }
  0x90   :  { %80 = dma.done.wait [#allocation1], 128  }
  0x91   :  { %81 = vsyncadd [#allocation1], 4294967168 }
  0x92   :  { %51 = vsyncpa [#allocation1], 1 }

// kernel: capsule_sequence_to_graph.1
= control target key start
LH: loop header
LB: loop body
LE: loop exit
PB: predicated region body
PF: predicated region fallthrough
CT: control target
= control target key end

     0   :  { %vm206_vm0 = vcmask 31744   ;;  %v1207_v0 = vmov 0.0   ;;  %vm214_vm1 = vcmask 1043456   ;;  %vm259_vm2 = vcmask 392192   ;;  %s1766_s1 = inlined_call_operand.vmem [shape: f32[384,32], index: 1, kind: input, shape index: {}]   ;;  %s1767_s0 = inlined_call_operand.vmem [shape: f32[48,384], index: 0, kind: input, shape index: {}]   ;;  %s1768_s4 = inlined_call_operand.vmem [shape: f32[4,32], index: 4, kind: input, shape index: {}]   ;;  %s1769_s2 = inlined_call_operand.vmem [shape: f32[6,48], index: 2, kind: input, shape index: {}]   ;;  %s1770_s3 = inlined_call_operand.vmem [shape: f32[48,6], index: 3, kind: input, shape index: {}]   ;;  %s1771_s5 = inlined_call_operand.vmem [shape: f32[32,4], index: 5, kind: input, shape index: {}]   ;;  %s1772_s6 = inlined_call_operand.vmem [shape: f32[6,32], index: 6, kind: output, shape index: {}]  }
   0x1   :  { %v207_v1 = vsel %vm206_vm0, 1.0, %v1207_v0  ;;  %v56_v2 = vld [vmem:[%s1766_s1 + $0x78] sm:$0xff]  ;;  %v55_v3 = vld [vmem:[%s1766_s1 + $0x70] sm:$0xff]  ;;  %v54_v4 = vld [vmem:[%s1766_s1 + $0x68] sm:$0xff]  ;;  %vm303_vm3 = vcmask 1045504   ;;  %vm284_vm4 = vcmask 48128  }
   0x2   :  { %208 = vadd.xlane.f32.xlu0 %v207_v1  ;;  %89 = vmatpush.msra.mxu0 %v56_v2  ;;  %v53_v5 = vld [vmem:[%s1766_s1 + $0x60] sm:$0xff]  ;;  %v88_v6 = vld [vmem:[%s1766_s1 + $0x178] sm:$0xff]  ;;  %v51_v8 = vld [vmem:[%s1766_s1 + $0x50] sm:$0xff]  ;;  %vm348_vm5 = vcmask 261120   ;;  %vm1046_vm6 = vcmask 259072  }
   0x3   :  { %v52_v7 = vld [vmem:[%s1766_s1 + $0x58] sm:$0xff]  ;;  %159 = vmatpush.msra.mxu2 %v88_v6  ;;  %v87_v9 = vld [vmem:[%s1766_s1 + $0x170] sm:$0xff]  ;;  %v86_v11 = vld [vmem:[%s1766_s1 + $0x168] sm:$0xff] }
   0x4   :  { %90 = vmatpush.msra.mxu0 %v55_v3  ;;  %v72_v10 = vld [vmem:[%s1766_s1 + $0xf8] sm:$0xff]  ;;  %v71_v12 = vld [vmem:[%s1766_s1 + $0xf0] sm:$0xff]  ;;  %v50_v13 = vld [vmem:[%s1766_s1 + $0x48] sm:$0xff] }
   0x5   :  { %160 = vmatpush.msra.mxu2 %v87_v9  ;;  %124 = vmatpush.msra.mxu1 %v72_v10  ;;  %v85_v14 = vld [vmem:[%s1766_s1 + $0x160] sm:$0xff]  ;;  %v70_v15 = vld [vmem:[%s1766_s1 + $0xe8] sm:$0xff]  ;;  %v84_v17 = vld [vmem:[%s1766_s1 + $0x158] sm:$0xff] }
   0x6   :  { %91 = vmatpush.msra.mxu0 %v54_v4  ;;  %v49_v16 = vld [vmem:[%s1766_s1 + $0x40] sm:$0xff]  ;;  %v48_v18 = vld [vmem:[%s1766_s1 + $0x38] sm:$0xff]  ;;  %v47_v19 = vld [vmem:[%s1766_s1 + $0x30] sm:$0xff] }
   0x7   :  { %161 = vmatpush.msra.mxu2 %v86_v11  ;;  %125 = vmatpush.msra.mxu1 %v71_v12  ;;  %v69_v20 = vld [vmem:[%s1766_s1 + $0xe0] sm:$0xff]  ;;  %v83_v21 = vld [vmem:[%s1766_s1 + $0x150] sm:$0xff]  ;;  %v68_v22 = vld [vmem:[%s1766_s1 + $0xd8] sm:$0xff] }
   0x8   :  { %92 = vmatpush.msra.mxu0 %v53_v5  ;;  %v82_v23 = vld [vmem:[%s1766_s1 + $0x148] sm:$0xff]  ;;  %v67_v25 = vld [vmem:[%s1766_s1 + $0xd0] sm:$0xff]  ;;  %v81_v26 = vld [vmem:[%s1766_s1 + $0x140] sm:$0xff] }
   0x9   :  { %162 = vmatpush.msra.mxu2 %v85_v14  ;;  %126 = vmatpush.msra.mxu1 %v70_v15  ;;  %v46_v24 = vld [vmem:[%s1766_s1 + $0x28] sm:$0xff]  ;;  %v45_v27 = vld [vmem:[%s1766_s1 + $0x20] sm:$0xff]  ;;  %v80_v29 = vld [vmem:[%s1766_s1 + $0x138] sm:$0xff] }
   0xa   :  { %93 = vmatpush.msra.mxu0 %v52_v7  ;;  %v66_v28 = vld [vmem:[%s1766_s1 + $0xc8] sm:$0xff]  ;;  %v44_v30 = vld [vmem:[%s1766_s1 + $0x18] sm:$0xff]  ;;  %v43_v31 = vld [vmem:[%s1766_s1 + $0x10] sm:$0xff] }
   0xb   :  { %163 = vmatpush.msra.mxu2 %v84_v17  ;;  %127 = vmatpush.msra.mxu1 %v69_v20  ;;  %v65_v32 = vld [vmem:[%s1766_s1 + $0xc0] sm:$0xff]  ;;  %v79_v33 = vld [vmem:[%s1766_s1 + $0x130] sm:$0xff]  ;;  %v64_v34 = vld [vmem:[%s1766_s1 + $0xb8] sm:$0xff] }
   0xc   :  { %94 = vmatpush.msra.mxu0 %v51_v8  ;;  %v78_v35 = vld [vmem:[%s1766_s1 + $0x128] sm:$0xff]  ;;  %v63_v37 = vld [vmem:[%s1766_s1 + $0xb0] sm:$0xff]  ;;  %v77_v38 = vld [vmem:[%s1766_s1 + $0x120] sm:$0xff] }
   0xd   :  { %164 = vmatpush.msra.mxu2 %v83_v21  ;;  %128 = vmatpush.msra.mxu1 %v68_v22  ;;  %v42_v36 = vld [vmem:[%s1766_s1 + $0x8] sm:$0xff]  ;;  %v41_v39 = vld [vmem:[%s1766_s1] sm:$0xff]  ;;  %v76_v42 = vld [vmem:[%s1766_s1 + $0x118] sm:$0xff] }
   0xe   :  { %95 = vmatpush.msra.mxu0 %v50_v13  ;;  %v62_v40 = vld [vmem:[%s1766_s1 + $0xa8] sm:$0xff]  ;;  %v23_v41 = vld [vmem:[%s1767_s0] sm:$0xff]  ;;  %v75_v44 = vld [vmem:[%s1766_s1 + $0x110] sm:$0xff] }
   0xf   :  { %165 = vmatpush.msra.mxu2 %v82_v23  ;;  %129 = vmatpush.msra.mxu1 %v67_v25  ;;  %v61_v43 = vld [vmem:[%s1766_s1 + $0xa0] sm:$0xff]  ;;  %v60_v45 = vld [vmem:[%s1766_s1 + $0x98] sm:$0xff]  ;;  %v74_v46 = vld [vmem:[%s1766_s1 + $0x108] sm:$0xff] }
  0x10   :  { %96 = vmatpush.msra.mxu0 %v49_v16  ;;  %v59_v47 = vld [vmem:[%s1766_s1 + $0x90] sm:$0xff]  ;;  %v73_v48 = vld [vmem:[%s1766_s1 + $0x100] sm:$0xff]  ;;  %v58_v50 = vld [vmem:[%s1766_s1 + $0x88] sm:$0xff] }
  0x11   :  { %166 = vmatpush.msra.mxu2 %v81_v26  ;;  %130 = vmatpush.msra.mxu1 %v66_v28  ;;  %v25_v49 = vld [vmem:[%s1767_s0 + $0x10] sm:$0xff]  ;;  %v26_v51 = vld [vmem:[%s1767_s0 + $0x18] sm:$0xff]  ;;  %v32_v53 = vld [vmem:[%s1767_s0 + $0x48] sm:$0xff] }
  0x12   :  { %97 = vmatpush.msra.mxu0 %v48_v18  ;;  %v29_v52 = vld [vmem:[%s1767_s0 + $0x30] sm:$0xff]  ;;  %v35_v54 = vld [vmem:[%s1767_s0 + $0x60] sm:$0xff]  ;;  %v38_v55 = vld [vmem:[%s1767_s0 + $0x78] sm:$0xff] }
  0x13   :  { %167 = vmatpush.msra.mxu2 %v80_v29  ;;  %131 = vmatpush.msra.mxu1 %v65_v32  ;;  %v57_v56 = vld [vmem:[%s1766_s1 + $0x80] sm:$0xff]  ;;  %v24_v57 = vld [vmem:[%s1767_s0 + $0x8] sm:$0xff]  ;;  %v30_v62 = vld [vmem:[%s1767_s0 + $0x38] sm:$0xff] }
  0x14   :  { %98 = vmatpush.msra.mxu0 %v47_v19  ;;  %v28_v58 = vld [vmem:[%s1767_s0 + $0x28] sm:$0xff]  ;;  %v1418_v59 = vld [vmem:[%s1768_s4] sm:$0xf]  ;;  %v34_v63 = vld [vmem:[%s1767_s0 + $0x58] sm:$0xff] }
  0x15   :  { %168 = vmatpush.msra.mxu2 %v79_v33  ;;  %132 = vmatpush.msra.mxu1 %v64_v34  ;;  %v27_v60 = vld [vmem:[%s1767_s0 + $0x20] sm:$0xff]  ;;  %v33_v0 = vld [vmem:[%s1767_s0 + $0x50] sm:$0xff]  ;;  %v36_v3 = vld [vmem:[%s1767_s0 + $0x68] sm:$0xff] }
  0x16   :  { %99 = vmatpush.msra.mxu0 %v46_v24  ;;  %1123 = vmatpush.msk.msra.mxu3 %vm214_vm1, %v1418_v59  ;;  %v31_v61 = vld [vmem:[%s1767_s0 + $0x40] sm:$0xff]  ;;  %v37_v1 = vld [vmem:[%s1767_s0 + $0x70] sm:$0xff]  ;;  %v40_v4 = vld [vmem:[%s1767_s0 + $0x88] sm:$0xff] }
  0x17   :  { %169 = vmatpush.msra.mxu2 %v78_v35  ;;  %133 = vmatpush.msra.mxu1 %v63_v37  ;;  %v39_v6 = vld [vmem:[%s1767_s0 + $0x80] sm:$0xff] }
  0x18   :  { %100 = vmatpush.msra.mxu0 %v45_v27 }
  0x19   :  { %170 = vmatpush.msra.mxu2 %v77_v38  ;;  %134 = vmatpush.msra.mxu1 %v62_v40 }
  0x1a   :  { %101 = vmatpush.msra.mxu0 %v44_v30 }
  0x1b   :  { %171 = vmatpush.msra.mxu2 %v76_v42  ;;  %135 = vmatpush.msra.mxu1 %v61_v43 }
  0x1c   :  { %102 = vmatpush.msra.mxu0 %v43_v31 }
  0x1d   :  { %172 = vmatpush.msra.mxu2 %v75_v44  ;;  %136 = vmatpush.msra.mxu1 %v60_v45 }
  0x1e   :  { %103 = vmatpush.msra.mxu0 %v42_v36 }
  0x1f   :  { %173 = vmatpush.msra.mxu2 %v74_v46  ;;  %137 = vmatpush.msra.mxu1 %v59_v47 }
  0x20   :  { %104 = vmatpush.msra.mxu0 %v41_v39 }
  0x21   :  { %105 = vmatmul.f32.vlgmr.msra.gmra.mxu0 %v23_v41  ;;  %174 = vmatpush.msra.mxu2 %v73_v48 }
  0x22   :  { %175 = vmatmul.f32.vlgmr.msra.gmra.mxu2 %v25_v49  ;;  %138 = vmatpush.msra.mxu1 %v58_v50  ;;  %v1478_v49 = vld [vmem:[%s1769_s2] sm:$0x3f] }
  0x23   :  { %1052 = vmatpush.msk.msrb.mxu0 %vm214_vm1, %v1418_v59 }
  0x24   :  { %139 = vmatpush.msra.mxu1 %v57_v56  ;;  %v1516_v56 = vld [vmem:[%s1770_s3 + $0x10] sm:$0xff] }
  0x25   :  { %140 = vmatmul.f32.vlgmr.msra.gmra.mxu1 %v24_v57  ;;  %v1523_v57 = vld [vmem:[%s1770_s3 + $0x18] sm:$0xff] }
  0x29   :  { %108 = vmatmul.f32.gmra.mxu0 %v26_v51  ;;  %v1487_v51 = vld [vmem:[%s1770_s3] sm:$0xff] }
  0x2a   :  { %178 = vmatmul.f32.gmra.mxu2 %v28_v58  ;;  %v1530_v58 = vld [vmem:[%s1770_s3 + $0x20] sm:$0xff] }
  0x2d   :  { %143 = vmatmul.f32.gmra.mxu1 %v27_v60  ;;  %v1537_v60 = vld [vmem:[%s1770_s3 + $0x28] sm:$0xff] }
  0x31   :  { %111 = vmatmul.f32.gmra.mxu0 %v29_v52 }
  0x32   :  { %181 = vmatmul.f32.gmra.mxu2 %v31_v61  ;;  %v1544_v61 = vld [vmem:[%s1771_s5 + $0x8] sm:$0xff] }
  0x35   :  { %146 = vmatmul.f32.gmra.mxu1 %v30_v62  ;;  %v1551_v62 = vld [vmem:[%s1771_s5] sm:$0xff] }
  0x39   :  { %114 = vmatmul.f32.gmra.mxu0 %v32_v53  ;;  %v1495_v53 = vld [vmem:[%s1770_s3 + $0x8] sm:$0xff] }
  0x3a   :  { %184 = vmatmul.f32.gmra.mxu2 %v34_v63 }
  0x3d   :  { %149 = vmatmul.f32.gmra.mxu1 %v33_v0 }
  0x41   :  { %117 = vmatmul.f32.gmra.mxu0 %v35_v54  ;;  %v1502_v54 = vld [vmem:[%s1771_s5 + $0x18] sm:$0xff] }
  0x42   :  { %187 = vmatmul.f32.gmra.mxu2 %v37_v1  ;;  %379 = vmatpush.msra.mxu0 %v1502_v54 }
  0x45   :  { %152 = vmatmul.f32.gmra.mxu1 %v36_v3 }
  0x49   :  { %120 = vmatmul.f32.gmra.mxu0 %v38_v55  ;;  %v1507_v55 = vld [vmem:[%s1771_s5 + $0x10] sm:$0xff] }
  0x4a   :  { %190 = vmatmul.f32.gmra.mxu2 %v40_v4  ;;  %380 = vmatpush.msra.mxu0 %v1507_v55 }
  0x4c   :  { %381 = vmatpush.msra.mxu0 %v1544_v61 }
  0x4d   :  { %155 = vmatmul.f32.gmra.mxu1 %v39_v6 }
  0x4e   :  { %382 = vmatpush.msra.mxu0 %v1551_v62 }
  0x75   :  { %v209_v2 = vpop.xlane.xlu0 %208 }
  0x76   :  { %1125 = vrcp.f32 %v209_v2 }
  0x7c   :  { %v1126_v5 = vpop.eup %1125 }
  0x7d   :  { %1053 = vmatmul.msk.f32.vlgmr.msrb.gmra.mxu0 %vm206_vm0, %v1126_v5  ;;  %1054 = vmatmul.msk.f32.vlgmr.msra.gmra.mxu3 %vm206_vm0, %v1126_v5 }
  0x7e   :  { %1094 = vmatpush.msk.msrb.mxu0 %vm214_vm1, %v1418_v59 }
  0x85   :  { %1055 = vmatmul.msk.f32.gmra.mxu3 %vm206_vm0, %v1126_v5 }
  0x8d   :  { %1056 = vmatmul.msk.f32.gmra.mxu3 %vm206_vm0, %v1126_v5 }
  0x95   :  { %1057 = vmatmul.msk.f32.gmra.mxu3 %vm206_vm0, %v1126_v5 }
  0x9d   :  { %1058 = vmatmul.msk.f32.gmra.mxu3 %vm206_vm0, %v1126_v5 }
  0x9e   :  { %v106_v8 = vpop.f32.mrf.mxu0 }
  0xa2   :  { %v141_v7 = vpop.f32.mrf.mxu1 }
  0xa3   :  { %v142_v41 = vadd.f32 %v141_v7, %v106_v8 }
  0xa5   :  { %v176_v9 = vpop.f32.mrf.mxu2 }
  0xa6   :  { %v109_v11 = vpop.f32.mrf.mxu0  ;;  %v1471_v46 = vadd.f32 %v176_v9, %v142_v41 }
  0xaa   :  { %v144_v10 = vpop.f32.mrf.mxu1 }
  0xab   :  { %v145_v36 = vadd.f32 %v144_v10, %v109_v11 }
  0xad   :  { %v179_v12 = vpop.f32.mrf.mxu2 }
  0xae   :  { %v112_v14 = vpop.f32.mrf.mxu0  ;;  %v1467_v42 = vadd.f32 %v179_v12, %v145_v36 }
  0xb2   :  { %v147_v13 = vpop.f32.mrf.mxu1 }
  0xb3   :  { %v148_v33 = vadd.f32 %v147_v13, %v112_v14 }
  0xb5   :  { %v182_v15 = vpop.f32.mrf.mxu2 }
  0xb6   :  { %v115_v18 = vpop.f32.mrf.mxu0  ;;  %v1464_v39 = vadd.f32 %v182_v15, %v148_v33 }
  0xba   :  { %v150_v17 = vpop.f32.mrf.mxu1 }
  0xbb   :  { %v151_v31 = vadd.f32 %v150_v17, %v115_v18 }
  0xbd   :  { %v185_v19 = vpop.f32.mrf.mxu2 }
  0xbe   :  { %v118_v22 = vpop.f32.mrf.mxu0  ;;  %v1461_v37 = vadd.f32 %v185_v19, %v151_v31 }
  0xc2   :  { %v153_v21 = vpop.f32.mrf.mxu1 }
  0xc3   :  { %v154_v30 = vadd.f32 %v153_v21, %v118_v22 }
  0xc5   :  { %v188_v24 = vpop.f32.mrf.mxu2 }
  0xc6   :  { %v121_v26 = vpop.f32.mrf.mxu0  ;;  %v1459_v34 = vadd.f32 %v188_v24, %v154_v30 }
  0xca   :  { %v156_v25 = vpop.f32.mrf.mxu1 }
  0xcb   :  { %v157_v28 = vadd.f32 %v156_v25, %v121_v26 }
  0xcd   :  { %v191_v29 = vpop.f32.mrf.mxu2 }
  0xce   :  { %v1457_v32 = vadd.f32 %v191_v29, %v157_v28 }
  0xfa   :  { %v235_v45 = vpop.f32.mrf.mxu0 }
  0xfb   :  { %v253_v48 = vmul.f32 %v235_v45, %v1471_v46 }
 0x100   :  { %v238_v16 = vpop.f32.mrf.mxu3 }
 0x101   :  { %v254_v47 = vmul.f32 %v238_v16, %v1467_v42 }
 0x108   :  { %v241_v20 = vpop.f32.mrf.mxu3 }
 0x109   :  { %v255_v44 = vmul.f32 %v241_v20, %v1464_v39 }
 0x110   :  { %v244_v23 = vpop.f32.mrf.mxu3 }
 0x111   :  { %v256_v43 = vmul.f32 %v244_v23, %v1461_v37 }
 0x118   :  { %v247_v27 = vpop.f32.mrf.mxu3 }
 0x119   :  { %v257_v40 = vmul.f32 %v247_v27, %v1459_v34 }
 0x120   :  { %v250_v35 = vpop.f32.mrf.mxu3 }
 0x121   :  { %v258_v38 = vmul.f32 %v250_v35, %v1457_v32 }
 0x123   :  { %273 = vmatpush.msrb.mxu1 %v258_v38 }
 0x125   :  { %274 = vmatpush.msrb.mxu1 %v257_v40 }
 0x127   :  { %275 = vmatpush.msrb.mxu1 %v256_v43 }
 0x129   :  { %276 = vmatpush.msrb.mxu1 %v255_v44 }
 0x12b   :  { %277 = vmatpush.msrb.mxu1 %v254_v47 }
 0x12d   :  { %278 = vmatpush.msrb.mxu1 %v253_v48 }
 0x12e   :  { %1059 = vmatmul.msk.f32.vlgmr.msrb.gmra.mxu1 %vm259_vm2, %v1478_v49 }
 0x12f   :  { %1073 = vmatpush.msk.msra.mxu1 %vm214_vm1, %v1418_v59 }
 0x1ab   :  { %v280_v50 = vpop.f32.mrf.mxu1 }
 0x1ac   :  { %1127 = vtanh.f32 %v280_v50 }
 0x1b2   :  { %v1128_v52 = vpop.eup %1127 }
 0x1b3   :  { %1060 = vmatpush.msk.msrb.mxu3 %vm303_vm3, %v1128_v52 }
 0x1b4   :  { %1061 = vmatmul.msk.f32.vlgmr.msrb.gmra.mxu3 %vm284_vm4, %v1487_v51 }
 0x1b5   :  { %622 = vmatpush.msra.mxu3 %v1502_v54 }
 0x1b7   :  { %623 = vmatpush.msra.mxu3 %v1507_v55 }
 0x1b9   :  { %624 = vmatpush.msra.mxu3 %v1544_v61 }
 0x1bb   :  { %625 = vmatpush.msra.mxu3 %v1551_v62 }
 0x1bc   :  { %1062 = vmatmul.msk.f32.gmra.mxu3 %vm284_vm4, %v1495_v53 }
 0x1bd   :  { %1115 = vmatpush.msk.msrb.mxu3 %vm214_vm1, %v1418_v59 }
 0x1c4   :  { %1063 = vmatmul.msk.f32.gmra.mxu3 %vm284_vm4, %v1516_v56 }
 0x1cc   :  { %1064 = vmatmul.msk.f32.gmra.mxu3 %vm284_vm4, %v1523_v57 }
 0x1d4   :  { %1065 = vmatmul.msk.f32.gmra.mxu3 %vm284_vm4, %v1530_v58 }
 0x1dc   :  { %1066 = vmatmul.msk.f32.gmra.mxu3 %vm284_vm4, %v1537_v60 }
 0x237   :  { %v324_v63 = vpop.f32.mrf.mxu3 }
 0x238   :  { %v342_v0 = vmul.f32 %v324_v63, %v1471_v46 }
 0x23a   :  { %1067 = vmatmul.msk.f32.vlgmr.msra.gmra.mxu0 %vm348_vm5, %v342_v0 }
 0x23f   :  { %v327_v1 = vpop.f32.mrf.mxu3 }
 0x240   :  { %v343_v2 = vmul.f32 %v327_v1, %v1467_v42 }
 0x242   :  { %1068 = vmatmul.msk.f32.gmra.mxu0 %vm348_vm5, %v343_v2 }
 0x247   :  { %v330_v3 = vpop.f32.mrf.mxu3 }
 0x248   :  { %v344_v4 = vmul.f32 %v330_v3, %v1464_v39 }
 0x24a   :  { %1069 = vmatmul.msk.f32.gmra.mxu0 %vm348_vm5, %v344_v4 }
 0x24f   :  { %v333_v5 = vpop.f32.mrf.mxu3 }
 0x250   :  { %v345_v6 = vmul.f32 %v333_v5, %v1461_v37 }
 0x252   :  { %1070 = vmatmul.msk.f32.gmra.mxu0 %vm348_vm5, %v345_v6 }
 0x257   :  { %v336_v59 = vpop.f32.mrf.mxu3 }
 0x258   :  { %v346_v7 = vmul.f32 %v336_v59, %v1459_v34 }
 0x25a   :  { %1071 = vmatmul.msk.f32.gmra.mxu0 %vm348_vm5, %v346_v7 }
 0x25f   :  { %v339_v8 = vpop.f32.mrf.mxu3 }
 0x260   :  { %v347_v9 = vmul.f32 %v339_v8, %v1457_v32 }
 0x262   :  { %1072 = vmatmul.msk.f32.gmra.mxu0 %vm348_vm5, %v347_v9 }
 0x2b7   :  { %v1571_v10 = vpop.f32.mrf.mxu0 }
 0x2b8   :  { %v402_v11 = vsel %vm206_vm0, %v1571_v10, -inf }
 0x2b9   :  { %403 = vmax.xlane.f32.xlu0 %v402_v11 }
 0x2bf   :  { %v1575_v12 = vpop.f32.mrf.mxu0 }
 0x2c0   :  { %v405_v13 = vsel %vm206_vm0, %v1575_v12, -inf }
 0x2c1   :  { %406 = vmax.xlane.f32.xlu1 %v405_v13 }
 0x2c7   :  { %v1579_v14 = vpop.f32.mrf.mxu0 }
 0x2c8   :  { %v408_v15 = vsel %vm206_vm0, %v1579_v14, -inf }
 0x2c9   :  { %409 = vmax.xlane.f32.xlu1 %v408_v15 }
 0x2cf   :  { %v1583_v16 = vpop.f32.mrf.mxu0 }
 0x2d0   :  { %v411_v17 = vsel %vm206_vm0, %v1583_v16, -inf }
 0x2d1   :  { %412 = vmax.xlane.f32.xlu2 %v411_v17 }
 0x2d7   :  { %v1587_v18 = vpop.f32.mrf.mxu0 }
 0x2d8   :  { %v414_v19 = vsel %vm206_vm0, %v1587_v18, -inf }
 0x2d9   :  { %415 = vmax.xlane.f32.xlu2 %v414_v19 }
 0x2df   :  { %v1591_v20 = vpop.f32.mrf.mxu0 }
 0x2e0   :  { %v417_v21 = vsel %vm206_vm0, %v1591_v20, -inf }
 0x2e1   :  { %418 = vmax.xlane.f32.xlu0 %v417_v21 }
 0x32c   :  { %v404_v22 = vpop.xlane.xlu0 %403 }
 0x32d   :  { %v420_v23 = vsub.f32 %v1571_v10, %v404_v22 }
 0x32f   :  { %v426_v24 = vmul.f32 1.442695, %v420_v23 }
 0x331   :  { %1129 = vpow2.f32 %v426_v24 }
 0x334   :  { %v407_v25 = vpop.xlane.xlu1 %406 }
 0x335   :  { %v421_v26 = vsub.f32 %v1575_v12, %v407_v25 }
 0x337   :  { %v1130_v27 = vpop.eup %1129  ;;  %v428_v28 = vmul.f32 1.442695, %v421_v26 }
 0x338   :  { %v438_v29 = vsel %vm206_vm0, %v1130_v27, 0.0 }
 0x339   :  { %1131 = vpow2.f32 %v428_v28  ;;  %439 = vadd.xlane.f32.xlu1 %v438_v29 }
 0x33c   :  { %v410_v30 = vpop.xlane.xlu1 %409 }
 0x33d   :  { %v422_v31 = vsub.f32 %v1579_v14, %v410_v30 }
 0x33f   :  { %v1132_v33 = vpop.eup %1131  ;;  %v430_v35 = vmul.f32 1.442695, %v422_v31 }
 0x340   :  { %v441_v36 = vsel %vm206_vm0, %v1132_v33, 0.0 }
 0x341   :  { %1133 = vpow2.f32 %v430_v35  ;;  %442 = vadd.xlane.f32.xlu2 %v441_v36 }
 0x344   :  { %v413_v38 = vpop.xlane.xlu2 %412 }
 0x345   :  { %v423_v40 = vsub.f32 %v1583_v16, %v413_v38 }
 0x347   :  { %v1134_v41 = vpop.eup %1133  ;;  %v432_v43 = vmul.f32 1.442695, %v423_v40 }
 0x348   :  { %v444_v44 = vsel %vm206_vm0, %v1134_v41, 0.0 }
 0x349   :  { %1135 = vpow2.f32 %v432_v43  ;;  %445 = vadd.xlane.f32.xlu0 %v444_v44 }
 0x34c   :  { %v416_v45 = vpop.xlane.xlu2 %415 }
 0x34d   :  { %v424_v47 = vsub.f32 %v1587_v18, %v416_v45 }
 0x34f   :  { %v1136_v48 = vpop.eup %1135  ;;  %v434_v50 = vmul.f32 1.442695, %v424_v47 }
 0x350   :  { %v447_v52 = vsel %vm206_vm0, %v1136_v48, 0.0 }
 0x351   :  { %1137 = vpow2.f32 %v434_v50  ;;  %448 = vadd.xlane.f32.xlu1 %v447_v52 }
 0x354   :  { %v419_v63 = vpop.xlane.xlu0 %418 }
 0x355   :  { %v425_v0 = vsub.f32 %v1591_v20, %v419_v63 }
 0x357   :  { %v1138_v1 = vpop.eup %1137  ;;  %v436_v2 = vmul.f32 1.442695, %v425_v0 }
 0x358   :  { %v450_v3 = vsel %vm206_vm0, %v1138_v1, 0.0 }
 0x359   :  { %1139 = vpow2.f32 %v436_v2  ;;  %451 = vadd.xlane.f32.xlu2 %v450_v3 }
 0x35f   :  { %v1140_v4 = vpop.eup %1139 }
 0x360   :  { %v453_v5 = vsel %vm206_vm0, %v1140_v4, 0.0 }
 0x361   :  { %454 = vadd.xlane.f32.xlu0 %v453_v5 }
 0x3ac   :  { %v440_v6 = vpop.xlane.xlu1 %439 }
 0x3ad   :  { %1141 = vrcp.f32 %v440_v6 }
 0x3b3   :  { %v1142_v59 = vpop.eup %1141 }
 0x3b4   :  { %v462_v7 = vmul.f32 %v1142_v59, %v1130_v27  ;;  %v443_v8 = vpop.xlane.xlu2 %442 }
 0x3b5   :  { %1143 = vrcp.f32 %v443_v8 }
 0x3b6   :  { %1074 = vmatmul.msk.f32.vlgmr.msra.gmra.mxu1 %vm206_vm0, %v462_v7 }
 0x3bb   :  { %v1144_v9 = vpop.eup %1143 }
 0x3bc   :  { %v446_v11 = vpop.xlane.xlu0 %445  ;;  %v463_v13 = vmul.f32 %v1144_v9, %v1132_v33 }
 0x3bd   :  { %1145 = vrcp.f32 %v446_v11 }
 0x3be   :  { %1075 = vmatmul.msk.f32.gmra.mxu1 %vm206_vm0, %v463_v13 }
 0x3c3   :  { %v1146_v15 = vpop.eup %1145 }
 0x3c4   :  { %v449_v17 = vpop.xlane.xlu1 %448  ;;  %v464_v19 = vmul.f32 %v1146_v15, %v1134_v41 }
 0x3c5   :  { %1147 = vrcp.f32 %v449_v17 }
 0x3c6   :  { %1076 = vmatmul.msk.f32.gmra.mxu1 %vm206_vm0, %v464_v19 }
 0x3cb   :  { %v1148_v21 = vpop.eup %1147 }
 0x3cc   :  { %v452_v22 = vpop.xlane.xlu2 %451  ;;  %v465_v23 = vmul.f32 %v1148_v21, %v1136_v48 }
 0x3cd   :  { %1149 = vrcp.f32 %v452_v22 }
 0x3ce   :  { %1077 = vmatmul.msk.f32.gmra.mxu1 %vm206_vm0, %v465_v23 }
 0x3d3   :  { %v1150_v24 = vpop.eup %1149 }
 0x3d4   :  { %v455_v25 = vpop.xlane.xlu0 %454  ;;  %v466_v26 = vmul.f32 %v1150_v24, %v1138_v1 }
 0x3d5   :  { %1151 = vrcp.f32 %v455_v25 }
 0x3d6   :  { %1078 = vmatmul.msk.f32.gmra.mxu1 %vm206_vm0, %v466_v26 }
 0x3db   :  { %v1152_v27 = vpop.eup %1151 }
 0x3dc   :  { %v467_v28 = vmul.f32 %v1152_v27, %v1140_v4 }
 0x3de   :  { %1079 = vmatmul.msk.f32.gmra.mxu1 %vm206_vm0, %v467_v28 }
 0x433   :  { %v503_v29 = vpop.f32.mrf.mxu1 }
 0x434   :  { %v521_v45 = vmul.f32 %v503_v29, %v1471_v46 }
 0x43b   :  { %v506_v30 = vpop.f32.mrf.mxu1 }
 0x43c   :  { %v522_v44 = vmul.f32 %v506_v30, %v1467_v42 }
 0x443   :  { %v509_v31 = vpop.f32.mrf.mxu1 }
 0x444   :  { %v523_v43 = vmul.f32 %v509_v31, %v1464_v39 }
 0x44b   :  { %v512_v33 = vpop.f32.mrf.mxu1 }
 0x44c   :  { %v524_v41 = vmul.f32 %v512_v33, %v1461_v37 }
 0x453   :  { %v515_v35 = vpop.f32.mrf.mxu1 }
 0x454   :  { %v525_v40 = vmul.f32 %v515_v35, %v1459_v34 }
 0x45b   :  { %v518_v36 = vpop.f32.mrf.mxu1 }
 0x45c   :  { %v526_v38 = vmul.f32 %v518_v36, %v1457_v32 }
 0x45e   :  { %537 = vmatpush.msrb.mxu2 %v526_v38 }
 0x460   :  { %538 = vmatpush.msrb.mxu2 %v525_v40 }
 0x462   :  { %539 = vmatpush.msrb.mxu2 %v524_v41 }
 0x464   :  { %540 = vmatpush.msrb.mxu2 %v523_v43 }
 0x466   :  { %541 = vmatpush.msrb.mxu2 %v522_v44 }
 0x468   :  { %542 = vmatpush.msrb.mxu2 %v521_v45 }
 0x469   :  { %1080 = vmatmul.msk.f32.vlgmr.msrb.gmra.mxu2 %vm259_vm2, %v1478_v49 }
 0x4ec   :  { %v544_v47 = vpop.f32.mrf.mxu2 }
 0x4ed   :  { %1153 = vtanh.f32 %v544_v47 }
 0x4f3   :  { %v1154_v48 = vpop.eup %1153 }
 0x4f4   :  { %1081 = vmatpush.msk.msra.mxu2 %vm303_vm3, %v1154_v48 }
 0x4f5   :  { %1082 = vmatmul.msk.f32.vlgmr.msra.gmra.mxu2 %vm284_vm4, %v1487_v51 }
 0x4f6   :  { %871 = vmatpush.msrb.mxu2 %v1502_v54 }
 0x4f8   :  { %872 = vmatpush.msrb.mxu2 %v1507_v55 }
 0x4fa   :  { %873 = vmatpush.msrb.mxu2 %v1544_v61 }
 0x4fc   :  { %874 = vmatpush.msrb.mxu2 %v1551_v62 }
 0x4fd   :  { %1083 = vmatmul.msk.f32.gmra.mxu2 %vm284_vm4, %v1495_v53 }
 0x505   :  { %1084 = vmatmul.msk.f32.gmra.mxu2 %vm284_vm4, %v1516_v56 }
 0x50d   :  { %1085 = vmatmul.msk.f32.gmra.mxu2 %vm284_vm4, %v1523_v57 }
 0x515   :  { %1086 = vmatmul.msk.f32.gmra.mxu2 %vm284_vm4, %v1530_v58 }
 0x51d   :  { %1087 = vmatmul.msk.f32.gmra.mxu2 %vm284_vm4, %v1537_v60 }
 0x578   :  { %v568_v54 = vpop.f32.mrf.mxu2 }
 0x579   :  { %v586_v55 = vmul.f32 %v568_v54, %v1471_v46 }
 0x57b   :  { %1088 = vmatmul.msk.f32.vlgmr.msra.gmra.mxu3 %vm348_vm5, %v586_v55 }
 0x580   :  { %v571_v61 = vpop.f32.mrf.mxu2 }
 0x581   :  { %v587_v62 = vmul.f32 %v571_v61, %v1467_v42 }
 0x583   :  { %1089 = vmatmul.msk.f32.gmra.mxu3 %vm348_vm5, %v587_v62 }
 0x588   :  { %v574_v50 = vpop.f32.mrf.mxu2 }
 0x589   :  { %v588_v52 = vmul.f32 %v574_v50, %v1464_v39 }
 0x58b   :  { %1090 = vmatmul.msk.f32.gmra.mxu3 %vm348_vm5, %v588_v52 }
 0x590   :  { %v577_v63 = vpop.f32.mrf.mxu2 }
 0x591   :  { %v589_v0 = vmul.f32 %v577_v63, %v1461_v37 }
 0x593   :  { %1091 = vmatmul.msk.f32.gmra.mxu3 %vm348_vm5, %v589_v0 }
 0x598   :  { %v580_v1 = vpop.f32.mrf.mxu2 }
 0x599   :  { %v590_v2 = vmul.f32 %v580_v1, %v1459_v34 }
 0x59b   :  { %1092 = vmatmul.msk.f32.gmra.mxu3 %vm348_vm5, %v590_v2 }
 0x5a0   :  { %v583_v3 = vpop.f32.mrf.mxu2 }
 0x5a1   :  { %v591_v4 = vmul.f32 %v583_v3, %v1457_v32 }
 0x5a3   :  { %1093 = vmatmul.msk.f32.gmra.mxu3 %vm348_vm5, %v591_v4 }
 0x5fe   :  { %v627_v5 = vpop.f32.mrf.mxu3 }
 0x5ff   :  { %v1651_v6 = vadd.f32 %v627_v5, %v1571_v10 }
 0x601   :  { %v651_v59 = vsel %vm206_vm0, %v1651_v6, -inf }
 0x602   :  { %652 = vmax.xlane.f32.xlu1 %v651_v59 }
 0x606   :  { %v630_v7 = vpop.f32.mrf.mxu3 }
 0x607   :  { %v1656_v8 = vadd.f32 %v630_v7, %v1575_v12 }
 0x609   :  { %v654_v9 = vsel %vm206_vm0, %v1656_v8, -inf }
 0x60a   :  { %655 = vmax.xlane.f32.xlu2 %v654_v9 }
 0x60e   :  { %v633_v11 = vpop.f32.mrf.mxu3 }
 0x60f   :  { %v1661_v13 = vadd.f32 %v633_v11, %v1579_v14 }
 0x611   :  { %v657_v10 = vsel %vm206_vm0, %v1661_v13, -inf }
 0x612   :  { %658 = vmax.xlane.f32.xlu0 %v657_v10 }
 0x616   :  { %v636_v15 = vpop.f32.mrf.mxu3 }
 0x617   :  { %v1666_v17 = vadd.f32 %v636_v15, %v1583_v16 }
 0x619   :  { %v660_v12 = vsel %vm206_vm0, %v1666_v17, -inf }
 0x61a   :  { %661 = vmax.xlane.f32.xlu1 %v660_v12 }
 0x61e   :  { %v639_v19 = vpop.f32.mrf.mxu3 }
 0x61f   :  { %v1671_v21 = vadd.f32 %v639_v19, %v1587_v18 }
 0x621   :  { %v663_v14 = vsel %vm206_vm0, %v1671_v21, -inf }
 0x622   :  { %664 = vmax.xlane.f32.xlu2 %v663_v14 }
 0x626   :  { %v642_v22 = vpop.f32.mrf.mxu3 }
 0x627   :  { %v1676_v23 = vadd.f32 %v642_v22, %v1591_v20 }
 0x629   :  { %v666_v16 = vsel %vm206_vm0, %v1676_v23, -inf }
 0x62a   :  { %667 = vmax.xlane.f32.xlu0 %v666_v16 }
 0x675   :  { %v653_v24 = vpop.xlane.xlu1 %652 }
 0x676   :  { %v669_v25 = vsub.f32 %v1651_v6, %v653_v24 }
 0x678   :  { %v675_v26 = vmul.f32 1.442695, %v669_v25 }
 0x67a   :  { %1155 = vpow2.f32 %v675_v26 }
 0x67d   :  { %v656_v27 = vpop.xlane.xlu2 %655 }
 0x67e   :  { %v670_v18 = vsub.f32 %v1656_v8, %v656_v27 }
 0x680   :  { %v1156_v28 = vpop.eup %1155  ;;  %v677_v29 = vmul.f32 1.442695, %v670_v18 }
 0x681   :  { %v687_v30 = vsel %vm206_vm0, %v1156_v28, 0.0 }
 0x682   :  { %1157 = vpow2.f32 %v677_v29  ;;  %688 = vadd.xlane.f32.xlu1 %v687_v30 }
 0x685   :  { %v659_v20 = vpop.xlane.xlu0 %658 }
 0x686   :  { %v671_v31 = vsub.f32 %v1661_v13, %v659_v20 }
 0x688   :  { %v1158_v33 = vpop.eup %1157  ;;  %v679_v35 = vmul.f32 1.442695, %v671_v31 }
 0x689   :  { %v690_v36 = vsel %vm206_vm0, %v1158_v33, 0.0 }
 0x68a   :  { %1159 = vpow2.f32 %v679_v35  ;;  %691 = vadd.xlane.f32.xlu2 %v690_v36 }
 0x68d   :  { %v662_v38 = vpop.xlane.xlu1 %661 }
 0x68e   :  { %v672_v40 = vsub.f32 %v1666_v17, %v662_v38 }
 0x690   :  { %v1160_v41 = vpop.eup %1159  ;;  %v681_v43 = vmul.f32 1.442695, %v672_v40 }
 0x691   :  { %v693_v44 = vsel %vm206_vm0, %v1160_v41, 0.0 }
 0x692   :  { %1161 = vpow2.f32 %v681_v43  ;;  %694 = vadd.xlane.f32.xlu0 %v693_v44 }
 0x695   :  { %v665_v45 = vpop.xlane.xlu2 %664 }
 0x696   :  { %v673_v47 = vsub.f32 %v1671_v21, %v665_v45 }
 0x698   :  { %v1162_v48 = vpop.eup %1161  ;;  %v683_v54 = vmul.f32 1.442695, %v673_v47 }
 0x699   :  { %v696_v55 = vsel %vm206_vm0, %v1162_v48, 0.0 }
 0x69a   :  { %1163 = vpow2.f32 %v683_v54  ;;  %697 = vadd.xlane.f32.xlu1 %v696_v55 }
 0x69d   :  { %v668_v61 = vpop.xlane.xlu0 %667 }
 0x69e   :  { %v674_v62 = vsub.f32 %v1676_v23, %v668_v61 }
 0x6a0   :  { %v1164_v50 = vpop.eup %1163  ;;  %v685_v52 = vmul.f32 1.442695, %v674_v62 }
 0x6a1   :  { %v699_v63 = vsel %vm206_vm0, %v1164_v50, 0.0 }
 0x6a2   :  { %1165 = vpow2.f32 %v685_v52  ;;  %700 = vadd.xlane.f32.xlu2 %v699_v63 }
 0x6a8   :  { %v1166_v0 = vpop.eup %1165 }
 0x6a9   :  { %v702_v1 = vsel %vm206_vm0, %v1166_v0, 0.0 }
 0x6aa   :  { %703 = vadd.xlane.f32.xlu0 %v702_v1 }
 0x6f5   :  { %v689_v2 = vpop.xlane.xlu1 %688 }
 0x6f6   :  { %1167 = vrcp.f32 %v689_v2 }
 0x6fc   :  { %v1168_v3 = vpop.eup %1167 }
 0x6fd   :  { %v711_v4 = vmul.f32 %v1168_v3, %v1156_v28  ;;  %v692_v5 = vpop.xlane.xlu2 %691 }
 0x6fe   :  { %1169 = vrcp.f32 %v692_v5 }
 0x6ff   :  { %1095 = vmatmul.msk.f32.vlgmr.msrb.gmra.mxu0 %vm206_vm0, %v711_v4 }
 0x704   :  { %v1170_v59 = vpop.eup %1169 }
 0x705   :  { %v695_v7 = vpop.xlane.xlu0 %694  ;;  %v712_v9 = vmul.f32 %v1170_v59, %v1158_v33 }
 0x706   :  { %1171 = vrcp.f32 %v695_v7 }
 0x707   :  { %1096 = vmatmul.msk.f32.gmra.mxu0 %vm206_vm0, %v712_v9 }
 0x70c   :  { %v1172_v11 = vpop.eup %1171 }
 0x70d   :  { %v698_v10 = vpop.xlane.xlu1 %697  ;;  %v713_v15 = vmul.f32 %v1172_v11, %v1160_v41 }
 0x70e   :  { %1173 = vrcp.f32 %v698_v10 }
 0x70f   :  { %1097 = vmatmul.msk.f32.gmra.mxu0 %vm206_vm0, %v713_v15 }
 0x714   :  { %v1174_v12 = vpop.eup %1173 }
 0x715   :  { %v701_v19 = vpop.xlane.xlu2 %700  ;;  %v714_v14 = vmul.f32 %v1174_v12, %v1162_v48 }
 0x716   :  { %1175 = vrcp.f32 %v701_v19 }
 0x717   :  { %1098 = vmatmul.msk.f32.gmra.mxu0 %vm206_vm0, %v714_v14 }
 0x71c   :  { %v1176_v22 = vpop.eup %1175 }
 0x71d   :  { %v704_v16 = vpop.xlane.xlu0 %703  ;;  %v715_v24 = vmul.f32 %v1176_v22, %v1164_v50 }
 0x71e   :  { %1177 = vrcp.f32 %v704_v16 }
 0x71f   :  { %1099 = vmatmul.msk.f32.gmra.mxu0 %vm206_vm0, %v715_v24 }
 0x724   :  { %v1178_v25 = vpop.eup %1177 }
 0x725   :  { %v716_v26 = vmul.f32 %v1178_v25, %v1166_v0 }
 0x727   :  { %1100 = vmatmul.msk.f32.gmra.mxu0 %vm206_vm0, %v716_v26 }
 0x77c   :  { %v752_v27 = vpop.f32.mrf.mxu0 }
 0x77d   :  { %v770_v40 = vmul.f32 %v752_v27, %v1471_v46 }
 0x784   :  { %v755_v18 = vpop.f32.mrf.mxu0 }
 0x785   :  { %v771_v38 = vmul.f32 %v755_v18, %v1467_v42 }
 0x78c   :  { %v758_v28 = vpop.f32.mrf.mxu0 }
 0x78d   :  { %v772_v36 = vmul.f32 %v758_v28, %v1464_v39 }
 0x794   :  { %v761_v29 = vpop.f32.mrf.mxu0 }
 0x795   :  { %v773_v35 = vmul.f32 %v761_v29, %v1461_v37 }
 0x79c   :  { %v764_v30 = vpop.f32.mrf.mxu0 }
 0x79d   :  { %v774_v33 = vmul.f32 %v764_v30, %v1459_v34 }
 0x7a4   :  { %v767_v20 = vpop.f32.mrf.mxu0 }
 0x7a5   :  { %v775_v31 = vmul.f32 %v767_v20, %v1457_v32 }
 0x7a7   :  { %786 = vmatpush.msrb.mxu1 %v775_v31 }
 0x7a9   :  { %787 = vmatpush.msrb.mxu1 %v774_v33 }
 0x7ab   :  { %788 = vmatpush.msrb.mxu1 %v773_v35 }
 0x7ad   :  { %789 = vmatpush.msrb.mxu1 %v772_v36 }
 0x7af   :  { %790 = vmatpush.msrb.mxu1 %v771_v38 }
 0x7b1   :  { %791 = vmatpush.msrb.mxu1 %v770_v40 }
 0x7b2   :  { %1101 = vmatmul.msk.f32.vlgmr.msrb.gmra.mxu1 %vm259_vm2, %v1478_v49 }
 0x82f   :  { %v793_v41 = vpop.f32.mrf.mxu1 }
 0x830   :  { %1179 = vtanh.f32 %v793_v41 }
 0x836   :  { %v1180_v43 = vpop.eup %1179 }
 0x837   :  { %1102 = vmatpush.msk.msra.mxu1 %vm303_vm3, %v1180_v43 }
 0x838   :  { %1103 = vmatmul.msk.f32.vlgmr.msra.gmra.mxu1 %vm284_vm4, %v1487_v51 }
 0x840   :  { %1104 = vmatmul.msk.f32.gmra.mxu1 %vm284_vm4, %v1495_v53 }
 0x848   :  { %1105 = vmatmul.msk.f32.gmra.mxu1 %vm284_vm4, %v1516_v56 }
 0x850   :  { %1106 = vmatmul.msk.f32.gmra.mxu1 %vm284_vm4, %v1523_v57 }
 0x858   :  { %1107 = vmatmul.msk.f32.gmra.mxu1 %vm284_vm4, %v1530_v58 }
 0x860   :  { %1108 = vmatmul.msk.f32.gmra.mxu1 %vm284_vm4, %v1537_v60 }
 0x8b5   :  { %v817_v44 = vpop.f32.mrf.mxu1 }
 0x8b6   :  { %v835_v45 = vmul.f32 %v817_v44, %v1471_v46 }
 0x8b8   :  { %1109 = vmatmul.msk.f32.vlgmr.msrb.gmra.mxu2 %vm348_vm5, %v835_v45 }
 0x8bd   :  { %v820_v51 = vpop.f32.mrf.mxu1 }
 0x8be   :  { %v836_v53 = vmul.f32 %v820_v51, %v1467_v42 }
 0x8c0   :  { %1110 = vmatmul.msk.f32.gmra.mxu2 %vm348_vm5, %v836_v53 }
 0x8c5   :  { %v823_v56 = vpop.f32.mrf.mxu1 }
 0x8c6   :  { %v837_v47 = vmul.f32 %v823_v56, %v1464_v39 }
 0x8c8   :  { %1111 = vmatmul.msk.f32.gmra.mxu2 %vm348_vm5, %v837_v47 }
 0x8cd   :  { %v826_v57 = vpop.f32.mrf.mxu1 }
 0x8ce   :  { %v838_v58 = vmul.f32 %v826_v57, %v1461_v37 }
 0x8d0   :  { %1112 = vmatmul.msk.f32.gmra.mxu2 %vm348_vm5, %v838_v58 }
 0x8d5   :  { %v829_v60 = vpop.f32.mrf.mxu1 }
 0x8d6   :  { %v839_v48 = vmul.f32 %v829_v60, %v1459_v34 }
 0x8d8   :  { %1113 = vmatmul.msk.f32.gmra.mxu2 %vm348_vm5, %v839_v48 }
 0x8dd   :  { %v832_v54 = vpop.f32.mrf.mxu1 }
 0x8de   :  { %v840_v55 = vmul.f32 %v832_v54, %v1457_v32 }
 0x8e0   :  { %1114 = vmatmul.msk.f32.gmra.mxu2 %vm348_vm5, %v840_v55 }
 0x93b   :  { %v876_v61 = vpop.f32.mrf.mxu2 }
 0x93c   :  { %v894_v62 = vadd.f32 %v876_v61, %v1651_v6 }
 0x93e   :  { %v900_v50 = vsel %vm206_vm0, %v894_v62, -inf }
 0x93f   :  { %901 = vmax.xlane.f32.xlu1 %v900_v50 }
 0x943   :  { %v879_v52 = vpop.f32.mrf.mxu2 }
 0x944   :  { %v895_v63 = vadd.f32 %v879_v52, %v1656_v8 }
 0x946   :  { %v903_v0 = vsel %vm206_vm0, %v895_v63, -inf }
 0x947   :  { %904 = vmax.xlane.f32.xlu2 %v903_v0 }
 0x94b   :  { %v882_v1 = vpop.f32.mrf.mxu2 }
 0x94c   :  { %v896_v2 = vadd.f32 %v882_v1, %v1661_v13 }
 0x94e   :  { %v906_v3 = vsel %vm206_vm0, %v896_v2, -inf }
 0x94f   :  { %907 = vmax.xlane.f32.xlu0 %v906_v3 }
 0x953   :  { %v885_v4 = vpop.f32.mrf.mxu2 }
 0x954   :  { %v897_v5 = vadd.f32 %v885_v4, %v1666_v17 }
 0x956   :  { %v909_v6 = vsel %vm206_vm0, %v897_v5, -inf }
 0x957   :  { %910 = vmax.xlane.f32.xlu1 %v909_v6 }
 0x95b   :  { %v888_v59 = vpop.f32.mrf.mxu2 }
 0x95c   :  { %v898_v7 = vadd.f32 %v888_v59, %v1671_v21 }
 0x95e   :  { %v912_v8 = vsel %vm206_vm0, %v898_v7, -inf }
 0x95f   :  { %913 = vmax.xlane.f32.xlu2 %v912_v8 }
 0x963   :  { %v891_v9 = vpop.f32.mrf.mxu2 }
 0x964   :  { %v899_v11 = vadd.f32 %v891_v9, %v1676_v23 }
 0x966   :  { %v915_v13 = vsel %vm206_vm0, %v899_v11, -inf }
 0x967   :  { %916 = vmax.xlane.f32.xlu0 %v915_v13 }
 0x9b2   :  { %v902_v10 = vpop.xlane.xlu1 %901 }
 0x9b3   :  { %v918_v15 = vsub.f32 %v894_v62, %v902_v10 }
 0x9b5   :  { %v924_v12 = vmul.f32 1.442695, %v918_v15 }
 0x9b7   :  { %1181 = vpow2.f32 %v924_v12 }
 0x9ba   :  { %v905_v17 = vpop.xlane.xlu2 %904 }
 0x9bb   :  { %v919_v19 = vsub.f32 %v895_v63, %v905_v17 }
 0x9bd   :  { %v1182_v14 = vpop.eup %1181  ;;  %v926_v22 = vmul.f32 1.442695, %v919_v19 }
 0x9be   :  { %v936_v16 = vsel %vm206_vm0, %v1182_v14, 0.0 }
 0x9bf   :  { %1183 = vpow2.f32 %v926_v22  ;;  %937 = vadd.xlane.f32.xlu1 %v936_v16 }
 0x9c2   :  { %v908_v21 = vpop.xlane.xlu0 %907 }
 0x9c3   :  { %v920_v24 = vsub.f32 %v896_v2, %v908_v21 }
 0x9c5   :  { %v1184_v25 = vpop.eup %1183  ;;  %v928_v26 = vmul.f32 1.442695, %v920_v24 }
 0x9c6   :  { %v939_v23 = vsel %vm206_vm0, %v1184_v25, 0.0 }
 0x9c7   :  { %1185 = vpow2.f32 %v928_v26  ;;  %940 = vadd.xlane.f32.xlu2 %v939_v23 }
 0x9ca   :  { %v911_v27 = vpop.xlane.xlu1 %910 }
 0x9cb   :  { %v921_v18 = vsub.f32 %v897_v5, %v911_v27 }
 0x9cd   :  { %v1186_v28 = vpop.eup %1185  ;;  %v930_v29 = vmul.f32 1.442695, %v921_v18 }
 0x9ce   :  { %v942_v30 = vsel %vm206_vm0, %v1186_v28, 0.0 }
 0x9cf   :  { %1187 = vpow2.f32 %v930_v29  ;;  %943 = vadd.xlane.f32.xlu0 %v942_v30 }
 0x9d2   :  { %v914_v20 = vpop.xlane.xlu2 %913 }
 0x9d3   :  { %v922_v31 = vsub.f32 %v898_v7, %v914_v20 }
 0x9d5   :  { %v1188_v33 = vpop.eup %1187  ;;  %v932_v35 = vmul.f32 1.442695, %v922_v31 }
 0x9d6   :  { %v945_v36 = vsel %vm206_vm0, %v1188_v33, 0.0 }
 0x9d7   :  { %1189 = vpow2.f32 %v932_v35  ;;  %946 = vadd.xlane.f32.xlu1 %v945_v36 }
 0x9da   :  { %v917_v38 = vpop.xlane.xlu0 %916 }
 0x9db   :  { %v923_v40 = vsub.f32 %v899_v11, %v917_v38 }
 0x9dd   :  { %v1190_v41 = vpop.eup %1189  ;;  %v934_v43 = vmul.f32 1.442695, %v923_v40 }
 0x9de   :  { %v948_v44 = vsel %vm206_vm0, %v1190_v41, 0.0 }
 0x9df   :  { %1191 = vpow2.f32 %v934_v43  ;;  %949 = vadd.xlane.f32.xlu2 %v948_v44 }
 0x9e5   :  { %v1192_v45 = vpop.eup %1191 }
 0x9e6   :  { %v951_v51 = vsel %vm206_vm0, %v1192_v45, 0.0 }
 0x9e7   :  { %952 = vadd.xlane.f32.xlu0 %v951_v51 }
 0xa32   :  { %v938_v53 = vpop.xlane.xlu1 %937 }
 0xa33   :  { %1193 = vrcp.f32 %v938_v53 }
 0xa39   :  { %v1194_v56 = vpop.eup %1193 }
 0xa3a   :  { %v960_v47 = vmul.f32 %v1194_v56, %v1182_v14  ;;  %v941_v57 = vpop.xlane.xlu2 %940 }
 0xa3b   :  { %1195 = vrcp.f32 %v941_v57 }
 0xa3c   :  { %1116 = vmatmul.msk.f32.vlgmr.msrb.gmra.mxu3 %vm206_vm0, %v960_v47 }
 0xa41   :  { %v1196_v58 = vpop.eup %1195 }
 0xa42   :  { %v944_v60 = vpop.xlane.xlu0 %943  ;;  %v961_v48 = vmul.f32 %v1196_v58, %v1184_v25 }
 0xa43   :  { %1197 = vrcp.f32 %v944_v60 }
 0xa44   :  { %1117 = vmatmul.msk.f32.gmra.mxu3 %vm206_vm0, %v961_v48 }
 0xa49   :  { %v1198_v54 = vpop.eup %1197 }
 0xa4a   :  { %v947_v55 = vpop.xlane.xlu1 %946  ;;  %v962_v61 = vmul.f32 %v1198_v54, %v1186_v28 }
 0xa4b   :  { %1199 = vrcp.f32 %v947_v55 }
 0xa4c   :  { %1118 = vmatmul.msk.f32.gmra.mxu3 %vm206_vm0, %v962_v61 }
 0xa51   :  { %v1200_v62 = vpop.eup %1199 }
 0xa52   :  { %v950_v50 = vpop.xlane.xlu2 %949  ;;  %v963_v52 = vmul.f32 %v1200_v62, %v1188_v33 }
 0xa53   :  { %1201 = vrcp.f32 %v950_v50 }
 0xa54   :  { %1119 = vmatmul.msk.f32.gmra.mxu3 %vm206_vm0, %v963_v52 }
 0xa59   :  { %v1202_v63 = vpop.eup %1201 }
 0xa5a   :  { %v953_v0 = vpop.xlane.xlu0 %952  ;;  %v964_v1 = vmul.f32 %v1202_v63, %v1190_v41 }
 0xa5b   :  { %1203 = vrcp.f32 %v953_v0 }
 0xa5c   :  { %1120 = vmatmul.msk.f32.gmra.mxu3 %vm206_vm0, %v964_v1 }
 0xa61   :  { %v1204_v2 = vpop.eup %1203 }
 0xa62   :  { %v965_v3 = vmul.f32 %v1204_v2, %v1192_v45 }
 0xa64   :  { %1121 = vmatmul.msk.f32.gmra.mxu3 %vm206_vm0, %v965_v3 }
 0xabf   :  { %v1001_v4 = vpop.f32.mrf.mxu3 }
 0xac0   :  { %v1019_v12 = vmul.f32 %v1001_v4, %v1471_v46 }
 0xac7   :  { %v1004_v5 = vpop.f32.mrf.mxu3 }
 0xac8   :  { %v1020_v15 = vmul.f32 %v1004_v5, %v1467_v42 }
 0xacf   :  { %v1007_v6 = vpop.f32.mrf.mxu3 }
 0xad0   :  { %v1021_v10 = vmul.f32 %v1007_v6, %v1464_v39 }
 0xad7   :  { %v1010_v59 = vpop.f32.mrf.mxu3 }
 0xad8   :  { %v1022_v13 = vmul.f32 %v1010_v59, %v1461_v37 }
 0xadf   :  { %v1013_v7 = vpop.f32.mrf.mxu3 }
 0xae0   :  { %v1023_v11 = vmul.f32 %v1013_v7, %v1459_v34 }
 0xae7   :  { %v1016_v8 = vpop.f32.mrf.mxu3 }
 0xae8   :  { %v1024_v9 = vmul.f32 %v1016_v8, %v1457_v32 }
 0xaea   :  { %1035 = vmatpush.msra.mxu0 %v1024_v9 }
 0xaec   :  { %1036 = vmatpush.msra.mxu0 %v1023_v11 }
 0xaee   :  { %1037 = vmatpush.msra.mxu0 %v1022_v13 }
 0xaf0   :  { %1038 = vmatpush.msra.mxu0 %v1021_v10 }
 0xaf2   :  { %1039 = vmatpush.msra.mxu0 %v1020_v15 }
 0xaf4   :  { %1040 = vmatpush.msra.mxu0 %v1019_v12 }
 0xaf5   :  { %1122 = vmatmul.msk.f32.vlgmr.msra.gmra.mxu0 %vm259_vm2, %v1478_v49 }
 0xb72   :  { %v1042_v32 = vpop.f32.mrf.mxu0 }
 0xb73   :  { %1205 = vtanh.f32 %v1042_v32 }
 0xb79   :  { %v1206_v34 = vpop.eup %1205 }
 0xb7a   :  { %1047 = vst.msk [vmem:[%s1772_s6] sm:$0x3f] %vm1046_vm6, %v1206_v34 }

</bundles_post_ra>
